<compile_context>
chip_gen: v7x
topology: tpu7x:2x2x1
jax: 0.10.0
libtpu: 0.0.40
codegen_flags: <defaults>
</compile_context>

<pallas_src>
import functools

import jax
import jax.numpy as jnp
from jax.experimental import pallas as pl
from jax.experimental.pallas import tpu as pltpu


def _soft_argmax_kernel(x_ref, c_ref, o_ref, *, beta: float):
    # x_ref: (1, TILE_NC, HW) input tile   (any float dtype; cast to f32 here)
    # c_ref: (HW, 3) resident coefficient matrix, columns [x/w, y/h, 1]
    # o_ref: (1, TILE_NC, 2) output tile
    x = x_ref[0].astype(jnp.float32) * jnp.float32(beta)        # (TILE_NC, HW)

    # Numerically-stable, *unnormalized* softmax numerator.
    m = jnp.max(x, axis=-1, keepdims=True)                      # (TILE_NC, 1)
    e = jnp.exp(x - m)                                          # (TILE_NC, HW)

    # One skinny MXU matmul fuses all three reductions:
    #   r[:, 0] = sum(e * x/w),  r[:, 1] = sum(e * y/h),  r[:, 2] = sum(e)
    r = jnp.dot(e, c_ref[...], preferred_element_type=jnp.float32)  # (TILE_NC, 3)

    # Deferred normalization on the tiny result (exact divide for accuracy).
    inv_s = 1.0 / r[:, 2:3]                                     # (TILE_NC, 1)
    o_ref[0] = (r[:, 0:2] * inv_s).astype(o_ref.dtype)          # (TILE_NC, 2)


def _pick_tile_nc(nc: int, hw: int, itemsize: int,
                  budget_bytes: int = 16 * 1024 * 1024) -> int:
    """Largest divisor of nc whose double-buffered block fits the VMEM budget.

    Tiles that don't span the full channel dim must be a multiple of 8
    (sublane constraint on the second-minor block dim).
    """
    max_tile = max(1, budget_bytes // (2 * hw * itemsize))
    best = None
    for t in range(1, nc + 1):
        if nc % t:
            continue
        if t != nc and t % 8:
            continue
        if t <= max_tile:
            best = t
    if best is None:
        # No divisor fits the budget; fall back to the smallest legal divisor.
        for t in range(1, nc + 1):
            if nc % t == 0 and (t == nc or t % 8 == 0):
                best = t
                break
    return best


def soft_argmax_2d(hm: jax.Array, beta: float = 1.0) -> jax.Array:
    """SoftArgmax2D forward. hm: (bs, nc, h, w) -> (bs, nc, 2) float32."""
    bs, nc, h, w = hm.shape
    hw = h * w

    # Flatten spatial dims so the kernel's trailing dim is lane-dense.
    hm_flat = hm.reshape(bs, nc, hw)

    # Coefficient matrix: columns [col/w, row/h, 1] for the flattened index.
    idx = jnp.arange(hw, dtype=jnp.int32)
    cx = (idx % w).astype(jnp.float32) / jnp.float32(w)
    cy = (idx // w).astype(jnp.float32) / jnp.float32(h)
    coef = jnp.stack([cx, cy, jnp.ones_like(cx)], axis=1)       # (hw, 3)

    tile_nc = _pick_tile_nc(nc, hw, jnp.dtype(hm.dtype).itemsize)
    grid = (bs, nc // tile_nc)

    kernel = functools.partial(_soft_argmax_kernel, beta=beta)
    return pl.pallas_call(
        kernel,
        out_shape=jax.ShapeDtypeStruct((bs, nc, 2), jnp.float32),
        grid_spec=pltpu.PrefetchScalarGridSpec(
            num_scalar_prefetch=0,
            grid=grid,
            in_specs=[
                pl.BlockSpec((1, tile_nc, hw), lambda b, c: (b, c, 0)),
                # Constant index_map: DMA'd once, stays resident in VMEM.
                pl.BlockSpec((hw, 3), lambda b, c: (0, 0)),
            ],
            out_specs=pl.BlockSpec((1, tile_nc, 2), lambda b, c: (b, c, 0)),
        ),
        compiler_params=pltpu.CompilerParams(
            dimension_semantics=("parallel", "parallel"),
            vmem_limit_bytes=32 * 1024 * 1024,
        ),
    )(hm_flat, coef)


def _reference(hm: jax.Array, beta: float = 1.0) -> jax.Array:
    # Pure-JAX reference mirroring the PyTorch module, for verification.
    bs, nc, h, w = hm.shape
    x = (hm * beta).astype(jnp.float32).reshape(bs, nc, h * w)
    p = jax.nn.softmax(x, axis=2).reshape(bs, nc, h, w)
    wx = (jnp.arange(w, dtype=jnp.float32) / w)[None, None, None, :]
    wy = (jnp.arange(h, dtype=jnp.float32) / h)[None, None, :, None]
    ax = jnp.sum(p * wx, axis=(2, 3))
    ay = jnp.sum(p * wy, axis=(2, 3))
    return jnp.stack([ax, ay], axis=2)


if __name__ == "__main__":
    key = jax.random.PRNGKey(0)
    bs, nc, h, w = 2, 4, 16, 16
    hm = jax.random.normal(key, (bs, nc, h, w), dtype=jnp.float32) * 3.0

    beta = 1.0
    out = soft_argmax_2d(hm, beta=beta)
    out = jax.block_until_ready(out)

    ref = _reference(hm, beta=beta)
    assert out.shape == (bs, nc, 2), out.shape
    assert jnp.allclose(out, ref, atol=1e-5, rtol=1e-5), (out, ref)

    print("KERNEL_OK")
</pallas_src>

<mosaic_0001>
module attributes {stable_mosaic.version = 11 : i64} {
  func.func @_soft_argmax_kernel(%arg0: i32, %arg1: i32, %arg2: memref<1x4x256xf32, #tpu.memory_space<vmem>>, %arg3: memref<256x3xf32, #tpu.memory_space<vmem>>, %arg4: memref<1x4x2xf32, #tpu.memory_space<vmem>>) attributes {dimension_semantics = [#tpu.dimension_semantics<parallel>, #tpu.dimension_semantics<parallel>], iteration_bounds = array<i64: 2, 1>, scalar_prefetch = 0 : i64, scratch_operands = 0 : i64, tpu.core_type = #tpu.core_type<tc>, window_params = [{transform_indices = @transform_0, window_bounds = array<i64: 1, 4, 256>}, {pipeline_mode = #tpu.pipeline_mode<synchronous>, transform_indices = @transform_1, window_bounds = array<i64: 256, 3>}, {transform_indices = @transform_2, window_bounds = array<i64: 1, 4, 2>}]} {
    %c0 = arith.constant 0 : index
    %c0_0 = arith.constant 0 : index
    %c0_1 = arith.constant 0 : index
    %0 = vector.load %arg2[%c0, %c0_0, %c0_1] : memref<1x4x256xf32, #tpu.memory_space<vmem>>, vector<1x4x256xf32>
    %1 = vector.shape_cast %0 : vector<1x4x256xf32> to vector<4x256xf32>
    %cst = arith.constant 1.000000e+00 : f32
    %2 = vector.broadcast %cst : f32 to vector<4x256xf32>
    %3 = arith.mulf %1, %2 : vector<4x256xf32>
    %cst_2 = arith.constant dense<0xFF800000> : vector<4xf32>
    %4 = vector.multi_reduction <maximumf>, %3, %cst_2 [1] : vector<4x256xf32> to vector<4xf32>
    %5 = vector.shape_cast %4 : vector<4xf32> to vector<4x1xf32>
    %6 = vector.broadcast %5 : vector<4x1xf32> to vector<4x256xf32>
    %7 = arith.subf %3, %6 : vector<4x256xf32>
    %8 = math.exp %7 : vector<4x256xf32>
    %c0_3 = arith.constant 0 : index
    %c0_4 = arith.constant 0 : index
    %9 = vector.load %arg3[%c0_3, %c0_4] : memref<256x3xf32, #tpu.memory_space<vmem>>, vector<256x3xf32>
    %cst_5 = arith.constant dense<0.000000e+00> : vector<4x3xf32>
    %10 = tpu.matmul %8, %9, %cst_5 {dimension_numbers = #tpu.dot_dimension_numbers<[1], [0], [0], [1], [0, 0, 1, 1], [], []>} : vector<4x256xf32>, vector<256x3xf32>, vector<4x3xf32> -> vector<4x3xf32>
    %11 = vector.extract_strided_slice %10 {offsets = [0, 2], sizes = [4, 1], strides = [1, 1]} : vector<4x3xf32> to vector<4x1xf32>
    %cst_6 = arith.constant 1.000000e+00 : f32
    %12 = vector.broadcast %cst_6 : f32 to vector<4x1xf32>
    %13 = arith.divf %12, %11 : vector<4x1xf32>
    %14 = vector.extract_strided_slice %10 {offsets = [0, 0], sizes = [4, 2], strides = [1, 1]} : vector<4x3xf32> to vector<4x2xf32>
    %15 = vector.broadcast %13 : vector<4x1xf32> to vector<4x2xf32>
    %16 = arith.mulf %14, %15 : vector<4x2xf32>
    %c0_7 = arith.constant 0 : index
    %c0_8 = arith.constant 0 : index
    %c0_9 = arith.constant 0 : index
    %17 = vector.load %arg4[%c0_7, %c0_8, %c0_9] : memref<1x4x2xf32, #tpu.memory_space<vmem>>, vector<1x4x2xf32>
    %18 = vector.shape_cast %17 : vector<1x4x2xf32> to vector<4x2xf32>
    %19 = vector.shape_cast %16 : vector<4x2xf32> to vector<1x4x2xf32>
    tpu.vector_store %arg4[%c0_7, %c0_8, %c0_9], %19 {strides = array<i32>} : memref<1x4x2xf32, #tpu.memory_space<vmem>>, vector<1x4x2xf32>,
    return
  }
  func.func @transform_0(%arg0: i32, %arg1: i32) -> (i32, i32, i32) {
    %c0_i32 = arith.constant 0 : i32
    %c0_i32_0 = arith.constant 0 : i32
    return %arg0, %arg1, %c0_i32 : i32, i32, i32
  }
  func.func @transform_1(%arg0: i32, %arg1: i32) -> (i32, i32) {
    %c0_i32 = arith.constant 0 : i32
    %c0_i32_0 = arith.constant 0 : i32
    %c0_i32_1 = arith.constant 0 : i32
    return %c0_i32, %c0_i32_0 : i32, i32
  }
  func.func @transform_2(%arg0: i32, %arg1: i32) -> (i32, i32, i32) {
    %c0_i32 = arith.constant 0 : i32
    %c0_i32_0 = arith.constant 0 : i32
    return %arg0, %arg1, %c0_i32 : i32, i32, i32
  }
}

</mosaic_0001>

<bundles_post_ra>
// kernel: tpu_custom_call.1
= control target key start
LH: loop header
LB: loop body
LE: loop exit
PB: predicated region body
PF: predicated region fallthrough
CT: control target
= control target key end

     0   :  { %s544_s9 = smov 0   ;;  %s546_s10 = smov 0   ;;  %s677_s0 = inlined_call_operand.vmem [shape: f32[2,4,256], index: 0, kind: input, shape index: {}]   ;;  %s678_s1 = inlined_call_operand.vmem [shape: f32[256,3], index: 1, kind: input, shape index: {}]   ;;  %s679_s2 = inlined_call_operand.vmem [shape: f32[2,4,2], index: 2, kind: output, shape index: {}]  }
   0x1   :  { %s548_s11 = smov 0  }
   0x2 LB: > { %s24_s12 = sadd.s32 1, %s521_s10  ;;  %p397_p0 = scmp.ge.s32.totalorder %s525_s11, 1  ;;  %s525_s11 = sphi %s548_s11, %s12_s11   ;;  %s521_s10 = sphi %s546_s10, %s681_s10   ;;  %s517_s9 = sphi %s544_s9, %s680_s9  }
   0x3   : > { %p26_p1 = scmp.ge.s32.totalorder %s24_s12, 2  ;;  %p132_p2 = scmp.lt.s32.totalorder %s525_s11, 3 }
   0x5   : > { %s683_s12 = smov (%p26_p1, %s24_s12), 0  ;;  %p133_p3 = pnand %p397_p0, %p132_p2 }
   0x6   : > { %p160_p4 = scmp.lt.s32.totalorder (!%p133_p3), %s517_s9, 1  ;;  %v214_v0 = vld [vmem:[%s678_s1 + $0x80] sm:$0xff] (!%p133_p3)  ;;  %v215_v1 = vld [vmem:[%s678_s1 + $0x88] sm:$0xff] (!%p133_p3)  ;;  %v216_v5 = vld [vmem:[%s678_s1 + $0x90] sm:$0xff] (!%p133_p3)  ;;  %vm180_vm0 = vcmask (!%p133_p3), 1043456   ;;  %v190_v55 = vlaneseq (!%p133_p3)  ;;  %vm311_vm1 = vcmask (!%p133_p3), 11264  }
   0x7   : > { %136 = sbr.rel (%p133_p3) target bundleno = 542 (0x21e), region = 28  ;;  %v198_v2 = vld [vmem:[%s678_s1] sm:$0xff] (!%p133_p3)  ;;  %v439_v3 = vpack.c.bf16 (!%p133_p3), %v215_v1, %v214_v0  ;;  %v199_v4 = vld [vmem:[%s678_s1 + $0x8] sm:$0xff] (!%p133_p3)  ;;  %v217_v6 = vld [vmem:[%s678_s1 + $0x98] sm:$0xff] (!%p133_p3)  ;;  %v527_v53 = vmov (!%p133_p3), 839922192  }
   0x8   : > { %v441_v7 = vpack.c.bf16 (!%p133_p3), %v199_v4, %v198_v2  ;;  %v443_v8 = vpack.c.bf16 (!%p133_p3), %v217_v6, %v216_v5  ;;  %v200_v9 = vld [vmem:[%s678_s1 + $0x10] sm:$0xff] (!%p133_p3)  ;;  %v201_v10 = vld [vmem:[%s678_s1 + $0x18] sm:$0xff] (!%p133_p3)  ;;  %v218_v11 = vld [vmem:[%s678_s1 + $0xa0] sm:$0xff] (!%p133_p3)  ;;  %v188_v54 = vunpack.c.l.s4 (!%p133_p3), %v527_v53  ;;  %v191_v57 = vshrl.u32 (!%p133_p3), %v190_v55, 7 }
   0x9   : > { %440 = vmatprep.subr.bf16.mxu0 (!%p133_p3), %v439_v3  ;;  %v219_v12 = vld [vmem:[%s678_s1 + $0xa8] sm:$0xff] (!%p133_p3)  ;;  %v445_v13 = vpack.c.bf16 (!%p133_p3), %v201_v10, %v200_v9  ;;  %v202_v15 = vld [vmem:[%s678_s1 + $0x20] sm:$0xff] (!%p133_p3)  ;;  %v220_v23 = vld [vmem:[%s678_s1 + $0xb0] sm:$0xff] (!%p133_p3)  ;;  %v528_v1 = vmov (!%p133_p3), 2  }
   0xa   : > { %442 = vmatpush3.bf16.msra.mxu0 (!%p133_p3), %v441_v7  ;;  %v447_v14 = vpack.c.bf16 (!%p133_p3), %v219_v12, %v218_v11  ;;  %v203_v16 = vld [vmem:[%s678_s1 + $0x28] sm:$0xff] (!%p133_p3)  ;;  %v221_v24 = vld [vmem:[%s678_s1 + $0xb8] sm:$0xff] (!%p133_p3)  ;;  %v204_v26 = vld [vmem:[%s678_s1 + $0x30] sm:$0xff] (!%p133_p3)  ;;  %v189_v56 = vunpack.c.0.s8 (!%p133_p3), %v188_v54  ;;  %497 = vset.pattern.permute.xlu0 (!%p133_p3), %v528_v1 }
   0xb   : > { %444 = vmatprep.subr.bf16.mxu0 (!%p133_p3), %v443_v8  ;;  %v449_v20 = vpack.c.bf16 (!%p133_p3), %v203_v16, %v202_v15  ;;  %v451_v25 = vpack.c.bf16 (!%p133_p3), %v221_v24, %v220_v23  ;;  %v205_v27 = vld [vmem:[%s678_s1 + $0x38] sm:$0xff] (!%p133_p3)  ;;  %v222_v29 = vld [vmem:[%s678_s1 + $0xc0] sm:$0xff] (!%p133_p3)  ;;  %v223_v30 = vld [vmem:[%s678_s1 + $0xc8] sm:$0xff] (!%p133_p3) }
   0xc   : > { %v453_v28 = vpack.c.bf16 (!%p133_p3), %v205_v27, %v204_v26  ;;  %v455_v31 = vpack.c.bf16 (!%p133_p3), %v223_v30, %v222_v29  ;;  %v206_v32 = vld [vmem:[%s678_s1 + $0x40] sm:$0xff] (!%p133_p3)  ;;  %v207_v33 = vld [vmem:[%s678_s1 + $0x48] sm:$0xff] (!%p133_p3)  ;;  %v224_v35 = vld [vmem:[%s678_s1 + $0xd0] sm:$0xff] (!%p133_p3)  ;;  %v192_v58 = vsub.s32 (!%p133_p3), %v189_v56, %v191_v57 }
   0xd   : > { %v457_v34 = vpack.c.bf16 (!%p133_p3), %v207_v33, %v206_v32  ;;  %v225_v36 = vld [vmem:[%s678_s1 + $0xd8] sm:$0xff] (!%p133_p3)  ;;  %v208_v38 = vld [vmem:[%s678_s1 + $0x50] sm:$0xff] (!%p133_p3)  ;;  %v226_v40 = vld [vmem:[%s678_s1 + $0xe0] sm:$0xff] (!%p133_p3) }
   0xe   : > { %s685_s9 = smov (!%p160_p4, %s517_s9), 1  ;;  %446 = vmatpush3.bf16.msra.mxu0 %v445_v13  ;;  %v459_v37 = vpack.c.bf16 %v225_v36, %v224_v35  ;;  %v209_v39 = vld [vmem:[%s678_s1 + $0x58] sm:$0xff]  ;;  %v227_v42 = vld [vmem:[%s678_s1 + $0xe8] sm:$0xff]  ;;  %v210_v43 = vld [vmem:[%s678_s1 + $0x60] sm:$0xff] }
   0xf   : > { %s403_s5 = sshll.u32 %s685_s9, 3  ;;  %448 = vmatprep.subr.bf16.mxu0 %v447_v14  ;;  %v461_v41 = vpack.c.bf16 %v209_v39, %v208_v38  ;;  %v211_v44 = vld [vmem:[%s678_s1 + $0x68] sm:$0xff]  ;;  %v463_v45 = vpack.c.bf16 %v227_v42, %v226_v40  ;;  %v228_v46 = vld [vmem:[%s678_s1 + $0xf0] sm:$0xff]  ;;  %v229_v47 = vld [vmem:[%s678_s1 + $0xf8] sm:$0xff] }
  0x10   : > { %s168_s8 = scalar_lea.vmem %s677_s0, %s403_s5  ;;  %v465_v48 = vpack.c.bf16 %v211_v44, %v210_v43  ;;  %v467_v49 = vpack.c.bf16 %v229_v47, %v228_v46  ;;  %v212_v50 = vld [vmem:[%s678_s1 + $0x70] sm:$0xff]  ;;  %v213_v51 = vld [vmem:[%s678_s1 + $0x78] sm:$0xff]  ;;  %s400_s5 = sshll.u32 %s685_s9, 2 }
  0x11   : > { %v176_v17 = vld [vmem:[%s168_s8] sm:$0xff]  ;;  %v469_v52 = vpack.c.bf16 %v213_v51, %v212_v50  ;;  %s175_s8 = scalar_lea.vmem %s679_s2, %s400_s5 }
  0x12   : > { %v178_v18 = vcombine.high %v176_v17, %v176_v17  ;;  %v181_v19 = vsel %vm180_vm0, %v176_v17, -inf  ;;  %450 = vmatpush3.bf16.msra.mxu0 %v449_v20 }
  0x13   : > { %452 = vmatprep.subr.bf16.mxu0 %v451_v25 }
  0x14   : > { %v182_v21 = vsel %vm180_vm0, %v178_v18, -inf }
  0x15   : > { %v183_v22 = vmax.f32 %v181_v19, %v182_v21 }
  0x16   : > { %454 = vmatpush3.bf16.msra.mxu0 %v453_v28 }
  0x17   : > { %184 = vmax.xlane.f32.xlu0 %v183_v22  ;;  %456 = vmatprep.subr.bf16.mxu0 %v455_v31 }
  0x1a   : > { %458 = vmatpush3.bf16.msra.mxu0 %v457_v34 }
  0x1b   : > { %460 = vmatprep.subr.bf16.mxu0 %v459_v37 }
  0x1e   : > { %462 = vmatpush3.bf16.msra.mxu0 %v461_v41 }
  0x1f   : > { %464 = vmatprep.subr.bf16.mxu0 %v463_v45 }
  0x22   : > { %466 = vmatpush3.bf16.msra.mxu0 %v465_v48 }
  0x23   : > { %468 = vmatprep.subr.bf16.mxu0 %v467_v49 }
  0x26   : > { %470 = vmatpush3.bf16.msra.mxu0 %v469_v52 }
  0xa4   : > { %v185_v59 = vpop.xlane.xlu0 %184 }
  0xa5   : > { %v193_v60 = vrot.slane %v185_v59, %v192_v58 }
  0xa7   : > { %v195_v61 = vsub.f32 %v176_v17, %v193_v60 }
  0xa9   : > { %v196_v62 = vmul.f32 1.442695, %v195_v61 }
  0xab   : > { %499 = vpow2.f32 %v196_v62 }
  0xb5   : > { %v500_v63 = vpop.eup %499 }
  0xb6   : > { %v231_v0 = vcombine.high %v500_v63, %v500_v63 }
  0xb8   : > { %297 = vmatprep.mubr.f32.mxu0 %v231_v0 }
  0xb9   : > { %298 = vmatmul.mubr.f32.vlgmr.msra.gmra.mrb[0].mxu0 %v500_v63 }
 0x18c   : > { %v436_v2 = vpop.f32.mrb[0].mxu0 }
 0x18d   : > { %v437_v3 = vpop.f32.mrb[1].mxu0 }
 0x18e   : > { %v438_v4 = vadd.f32 %v437_v3, %v436_v2 }
 0x190   : > { %501 = vrcp.f32 %v438_v4 }
 0x19a   : > { %v502_v5 = vpop.eup %501 }
 0x19b   : > { %307 = vperm.xlu0 %497, %v502_v5  }
 0x21a   : > { %v308_v6 = vpop.permute.xlu0 %307 }
 0x21b   : > { %v310_v7 = vmul.f32 %v438_v4, %v308_v6 }
 0x21d   : > { %312 = vst.msk [vmem:[%s175_s8] sm:$0xf] %vm311_vm1, %v310_v7 }
 0x21e PF: > { %s12_s11 = sadd.s32 1, %s525_s11   ;;  %s680_s9 = smov %s521_s10 }
 0x21f   : > { %p9_p5 = scmp.ge.s32.totalorder %s12_s11, 4   ;;  %s681_s10 = smov %s683_s12 }
 0x221   :  { %11 = sbr.rel (!%p9_p5) target bundleno = 2 (0x2), region = 58 }

</bundles_post_ra>
